<compile_context>
chip_gen: v5e
topology: v5e:2x2
jax: 0.10.0
libtpu: 0.0.40
codegen_flags: <defaults>
</compile_context>

<pallas_src>
import re

import jax
import jax.numpy as jnp
from jax.experimental import pallas as pl
from jax.experimental.pallas import tpu as pltpu


def _cprelu_kernel(a_ref, xr_ref, xi_ref, or_ref, oi_ref):
    """One (br, bc) tile of the real plane and the matching imag plane."""
    a = a_ref[...]                      # (br, 2): col 0 = real slope, col 1 = imag
    ar = a[:, 0:1]                      # (br, 1) -> broadcasts over lanes
    ai = a[:, 1:2]
    xr = xr_ref[...]                    # (br, bc) float32
    xi = xi_ref[...]
    or_ref[...] = jnp.where(xr > 0, xr, ar * xr)
    oi_ref[...] = jnp.where(xi > 0, xi, ai * xi)


def _tile_params():
    """Return (per-stream block target in f32 elems, scoped-VMEM limit bytes)."""
    gen = 6
    try:
        kind = jax.devices()[0].device_kind
        m = re.search(r"(\d+)", kind)
        if m:
            gen = int(m.group(1))
    except Exception:  # tiling heuristic only; any failure -> safe default
        pass
    if gen >= 7:
        # v7x: ~3.2 TB/s HBM, 64 MiB physical VMEM.  4 streams x 2 buffers x
        # 4 MiB = 32 MiB (+ tiny alpha) -> needs an explicit limit > 32 MiB.
        return 1024 * 1024, 48 * 1024 * 1024
    if gen == 6:
        # v6e: 128 MiB physical VMEM, lots of headroom for 4 MiB blocks.
        return 1024 * 1024, 64 * 1024 * 1024
    # v5e and older / unknown: ~2 MiB blocks are already ~93% of roofline.
    return 512 * 1024, 32 * 1024 * 1024


def _pick_block(rows, cols, target_elems):
    """Pick a lane-dense (br, bc) block honoring the (8, 128) constraint."""
    cap = 16384
    if cols <= cap:
        bc = cols                                  # full extent
    else:
        bc = cap                                   # ragged fallback
        for m in range(cap, 0, -128):              # largest 128-multiple divisor
            if cols % m == 0:
                bc = m
                break
    # Row block: multiple of 8 (or full rows) targeting ~target_elems / block.
    br = max(8, (target_elems // bc) // 8 * 8)
    br = min(rows, br)
    # Mid/large inputs: keep >= 4 programs so DMA/compute pipelining and the
    # megacore split stay active (a single program fully serializes in->out).
    if rows * cols >= 512 * 1024:
        while br > 8 and pl.cdiv(rows, br) * pl.cdiv(cols, bc) < 4:
            br = max(8, ((br // 2) + 7) // 8 * 8)
    return br, bc


@jax.jit
def cprelu_pallas(x_complex, alpha_real, alpha_imag):
    """Complex PReLU.

    x_complex: complex64 (N, C, H, W); alpha_real / alpha_imag: float32 (C,).
    """
    N, C, H, W = x_complex.shape
    rows, cols = N * C, H * W

    # Planar real / imag slabs, lane-dense on the last axis.
    xr = jnp.real(x_complex).astype(jnp.float32).reshape(rows, cols)
    xi = jnp.imag(x_complex).astype(jnp.float32).reshape(rows, cols)

    # Per-row (= per (n, c)) slopes packed into a single (rows, 2) array.
    a = jnp.stack(
        [alpha_real.astype(jnp.float32), alpha_imag.astype(jnp.float32)], axis=-1
    )                                               # (C, 2)
    a = jnp.broadcast_to(a[None], (N, C, 2)).reshape(rows, 2)

    target_elems, vmem_limit = _tile_params()
    br, bc = _pick_block(rows, cols, target_elems)
    grid = (pl.cdiv(rows, br), pl.cdiv(cols, bc))

    data_spec = pl.BlockSpec((br, bc), lambda i, j: (i, j))
    alpha_spec = pl.BlockSpec((br, 2), lambda i, j: (i, 0))

    out_r, out_i = pl.pallas_call(
        _cprelu_kernel,
        grid=grid,
        in_specs=[alpha_spec, data_spec, data_spec],
        out_specs=(data_spec, data_spec),
        out_shape=(
            jax.ShapeDtypeStruct((rows, cols), jnp.float32),
            jax.ShapeDtypeStruct((rows, cols), jnp.float32),
        ),
        # xr -> real output, xi -> imag output: outputs reuse the input buffers.
        input_output_aliases={1: 0, 2: 1},
        compiler_params=pltpu.CompilerParams(
            dimension_semantics=("parallel", "parallel"),
            vmem_limit_bytes=vmem_limit,
            allow_input_fusion=[False, True, True],
        ),
    )(a, xr, xi)

    return jax.lax.complex(out_r, out_i).reshape(N, C, H, W)


def cprelu_ref(x_complex, alpha_real, alpha_imag):
    """Pure-JAX reference for correctness checking."""
    xr = jnp.real(x_complex)
    xi = jnp.imag(x_complex)
    ar = alpha_real[None, :, None, None]
    ai = alpha_imag[None, :, None, None]
    r = jnp.where(xr > 0, xr, ar * xr)
    i = jnp.where(xi > 0, xi, ai * xi)
    return jax.lax.complex(r, i)


if __name__ == "__main__":
    N, C, H, W = 2, 4, 16, 16

    key = jax.random.PRNGKey(0)
    k_r, k_i = jax.random.split(key)
    x_real = jax.random.normal(k_r, (N, C, H, W), dtype=jnp.float32)
    x_imag = jax.random.normal(k_i, (N, C, H, W), dtype=jnp.float32)
    x = jax.lax.complex(x_real, x_imag)  # complex64

    # nn.PReLU default init is 0.25; use distinct per-channel / per-branch
    # values to exercise the per-channel slope selection in both branches.
    alpha_real = jnp.full((C,), 0.25, dtype=jnp.float32)
    alpha_imag = jnp.linspace(0.1, 0.4, C).astype(jnp.float32)

    out = cprelu_pallas(x, alpha_real, alpha_imag)
    out = jax.block_until_ready(out)

    expected = cprelu_ref(x, alpha_real, alpha_imag)
    assert out.dtype == jnp.complex64
    assert out.shape == (N, C, H, W)
    assert jnp.allclose(out, expected, atol=1e-6, rtol=1e-6)

    print("KERNEL_OK")
</pallas_src>

<mosaic_0001>
module attributes {stable_mosaic.version = 11 : i64} {
  func.func @_cprelu_kernel(%arg0: i32, %arg1: i32, %arg2: memref<8x2xf32, #tpu.memory_space<vmem>>, %arg3: memref<8x256xf32, #tpu.memory_space<vmem>>, %arg4: memref<8x256xf32, #tpu.memory_space<vmem>>, %arg5: memref<8x256xf32, #tpu.memory_space<vmem>>, %arg6: memref<8x256xf32, #tpu.memory_space<vmem>>) attributes {dimension_semantics = [#tpu.dimension_semantics<parallel>, #tpu.dimension_semantics<parallel>], iteration_bounds = array<i64: 1, 1>, scalar_prefetch = 0 : i64, scratch_operands = 0 : i64, tpu.core_type = #tpu.core_type<tc>, window_params = [{transform_indices = @transform_0, window_bounds = array<i64: 8, 2>}, {transform_indices = @transform_1, window_bounds = array<i64: 8, 256>}, {transform_indices = @transform_2, window_bounds = array<i64: 8, 256>}, {transform_indices = @transform_3, window_bounds = array<i64: 8, 256>}, {transform_indices = @transform_4, window_bounds = array<i64: 8, 256>}]} {
    %c0 = arith.constant 0 : index
    %c0_0 = arith.constant 0 : index
    %0 = vector.load %arg2[%c0, %c0_0] : memref<8x2xf32, #tpu.memory_space<vmem>>, vector<8x2xf32>
    %1 = vector.extract_strided_slice %0 {offsets = [0, 0], sizes = [8, 1], strides = [1, 1]} : vector<8x2xf32> to vector<8x1xf32>
    %2 = vector.extract_strided_slice %0 {offsets = [0, 1], sizes = [8, 1], strides = [1, 1]} : vector<8x2xf32> to vector<8x1xf32>
    %c0_1 = arith.constant 0 : index
    %c0_2 = arith.constant 0 : index
    %3 = vector.load %arg3[%c0_1, %c0_2] : memref<8x256xf32, #tpu.memory_space<vmem>>, vector<8x256xf32>
    %c0_3 = arith.constant 0 : index
    %c0_4 = arith.constant 0 : index
    %4 = vector.load %arg4[%c0_3, %c0_4] : memref<8x256xf32, #tpu.memory_space<vmem>>, vector<8x256xf32>
    %cst = arith.constant 0.000000e+00 : f32
    %5 = vector.broadcast %cst : f32 to vector<8x256xf32>
    %6 = arith.cmpf ogt, %3, %5 : vector<8x256xf32>
    %7 = vector.broadcast %1 : vector<8x1xf32> to vector<8x256xf32>
    %8 = arith.mulf %7, %3 : vector<8x256xf32>
    %9 = arith.select %6, %3, %8 : vector<8x256xi1>, vector<8x256xf32>
    %c0_5 = arith.constant 0 : index
    %c0_6 = arith.constant 0 : index
    %10 = vector.load %arg5[%c0_5, %c0_6] : memref<8x256xf32, #tpu.memory_space<vmem>>, vector<8x256xf32>
    tpu.vector_store %arg5[%c0_5, %c0_6], %9 {strides = array<i32>} : memref<8x256xf32, #tpu.memory_space<vmem>>, vector<8x256xf32>,
    %cst_7 = arith.constant 0.000000e+00 : f32
    %11 = vector.broadcast %cst_7 : f32 to vector<8x256xf32>
    %12 = arith.cmpf ogt, %4, %11 : vector<8x256xf32>
    %13 = vector.broadcast %2 : vector<8x1xf32> to vector<8x256xf32>
    %14 = arith.mulf %13, %4 : vector<8x256xf32>
    %15 = arith.select %12, %4, %14 : vector<8x256xi1>, vector<8x256xf32>
    %c0_8 = arith.constant 0 : index
    %c0_9 = arith.constant 0 : index
    %16 = vector.load %arg6[%c0_8, %c0_9] : memref<8x256xf32, #tpu.memory_space<vmem>>, vector<8x256xf32>
    tpu.vector_store %arg6[%c0_8, %c0_9], %15 {strides = array<i32>} : memref<8x256xf32, #tpu.memory_space<vmem>>, vector<8x256xf32>,
    return
  }
  func.func @transform_0(%arg0: i32, %arg1: i32) -> (i32, i32) {
    %c0_i32 = arith.constant 0 : i32
    %c0_i32_0 = arith.constant 0 : i32
    return %arg0, %c0_i32 : i32, i32
  }
  func.func @transform_1(%arg0: i32, %arg1: i32) -> (i32, i32) {
    %c0_i32 = arith.constant 0 : i32
    return %arg0, %arg1 : i32, i32
  }
  func.func @transform_2(%arg0: i32, %arg1: i32) -> (i32, i32) {
    %c0_i32 = arith.constant 0 : i32
    return %arg0, %arg1 : i32, i32
  }
  func.func @transform_3(%arg0: i32, %arg1: i32) -> (i32, i32) {
    %c0_i32 = arith.constant 0 : i32
    return %arg0, %arg1 : i32, i32
  }
  func.func @transform_4(%arg0: i32, %arg1: i32) -> (i32, i32) {
    %c0_i32 = arith.constant 0 : i32
    return %arg0, %arg1 : i32, i32
  }
}

</mosaic_0001>

<bundles_post_ra>
// kernel: custom-call.1
= control target key start
LH: loop header
LB: loop body
LE: loop exit
PB: predicated region body
PF: predicated region fallthrough
CT: control target
= control target key end

     0   :  { %s56_s0 = inlined_call_operand.hbm [shape: c64[2,4,16,16], index: 0, kind: input, shape index: {}]   ;;  %s57_s1 = inlined_call_operand.vmem [shape: f32[2,4,16,16], index: 1, kind: output, shape index: {}]  }
   0x1   :  { %s2_s8 = scalar_lea.hbm %s56_s0, 128 }
   0x2   :  { %3 = vsyncpa [#allocation0], 0  ;;  %s5_s9 = sshll.u32 %s2_s8, 4  ;;  %s7_s12 = sshll.u32 %s57_s1, 4  ;;  %s6_s9 = int_to_ptr.hbm [resolvable:$true] %s5_s9  ;;  %s8_s12 = int_to_ptr.vmem [resolvable:$true] %s7_s12 }
   0x3   :  { %10 = dma.hbm_to_vmem [thread:$0]  %s6_s9, 2048, %s8_s12, [#allocation0] }
   0x4   :  { %38 = dma.done.wait [#allocation0], 2048  }
   0x5   :  { %39 = vsyncadd [#allocation0], 4294965248 }
   0x6   :  { %13 = vsyncpa [#allocation0], 1 }

// kernel: custom-call
= control target key start
LH: loop header
LB: loop body
LE: loop exit
PB: predicated region body
PF: predicated region fallthrough
CT: control target
= control target key end

     0   :  { %2 = vsyncpa [#allocation0], 0  ;;  %s55_s0 = inlined_call_operand.hbm [shape: c64[2,4,16,16], index: 0, kind: input, shape index: {}]   ;;  %s56_s1 = inlined_call_operand.vmem [shape: f32[2,4,16,16], index: 1, kind: output, shape index: {}]  }
   0x1   :  { %s4_s8 = sshll.u32 %s55_s0, 4  ;;  %s6_s11 = sshll.u32 %s56_s1, 4  ;;  %s5_s8 = int_to_ptr.hbm [resolvable:$true] %s4_s8  ;;  %s7_s11 = int_to_ptr.vmem [resolvable:$true] %s6_s11 }
   0x2   :  { %9 = dma.hbm_to_vmem [thread:$0]  %s5_s8, 2048, %s7_s11, [#allocation0] }
   0x3   :  { %37 = dma.done.wait [#allocation0], 2048  }
   0x4   :  { %38 = vsyncadd [#allocation0], 4294965248 }
   0x5   :  { %12 = vsyncpa [#allocation0], 1 }

// kernel: custom-call.2
= control target key start
LH: loop header
LB: loop body
LE: loop exit
PB: predicated region body
PF: predicated region fallthrough
CT: control target
= control target key end

     0   :  { %s105_s0 = inlined_call_operand.vmem [shape: f32[2,4,16,16], index: 0, kind: input, shape index: {}]   ;;  %s106_s1 = inlined_call_operand.vmem [shape: f32[2,4,16,16], index: 1, kind: input, shape index: {}]   ;;  %s107_s2 = inlined_call_operand.hbm [shape: c64[2,4,16,16], index: 2, kind: output, shape index: {}]  }
   0x1   :  { %s3_s11 = scalar_lea.hbm %s107_s2, 128 }
   0x2   :  { %4 = vsyncpa [#allocation0], 0  ;;  %s6_s14 = sshll.u32 %s105_s0, 4  ;;  %s8_s17 = sshll.u32 %s107_s2, 4  ;;  %s7_s14 = int_to_ptr.vmem [resolvable:$true] %s6_s14  ;;  %s9_s17 = int_to_ptr.hbm [resolvable:$true] %s8_s17 }
   0x3   :  { %11 = dma.vmem_to_hbm [thread:$0]  %s7_s14, 2048, %s9_s17, [#allocation0] }
   0x4   :  { %74 = dma.done.wait [#allocation0], 2048  }
   0x5   :  { %75 = vsyncadd [#allocation0], 4294965248 }
   0x6   :  { %14 = vsyncpa [#allocation0], 1 }
   0x7   :  { %15 = vsyncpa [#allocation1], 0  ;;  %s17_s20 = sshll.u32 %s106_s1, 4  ;;  %s19_s21 = sshll.u32 %s3_s11, 4  ;;  %s18_s20 = int_to_ptr.vmem [resolvable:$true] %s17_s20  ;;  %s20_s21 = int_to_ptr.hbm [resolvable:$true] %s19_s21 }
   0x8   :  { %22 = dma.vmem_to_hbm [thread:$0]  %s18_s20, 2048, %s20_s21, [#allocation1] }
   0x9   :  { %76 = dma.done.wait [#allocation1], 2048  }
   0xa   :  { %77 = vsyncadd [#allocation1], 4294965248 }
   0xb   :  { %25 = vsyncpa [#allocation1], 1 }

// kernel: cprelu_pallas.1
= control target key start
LH: loop header
LB: loop body
LE: loop exit
PB: predicated region body
PF: predicated region fallthrough
CT: control target
= control target key end

     0   :  { %v58_v0 = vmov 0   ;;  %v59_v2 = vmov 1   ;;  %s112_s0 = inlined_call_operand.vmem [shape: f32[8,2], index: 0, kind: input, shape index: {}]   ;;  %s113_s1 = inlined_call_operand.vmem [shape: f32[8,256], index: 1, kind: input, shape index: {}, may-alias: {1,3}]   ;;  %s114_s3 = inlined_call_operand.vmem [shape: f32[8,256], index: 3, kind: output, shape index: {0}, may-alias: {1,3}]   ;;  %s115_s2 = inlined_call_operand.vmem [shape: f32[8,256], index: 2, kind: input, shape index: {}, may-alias: {2,4}]   ;;  %s116_s4 = inlined_call_operand.vmem [shape: f32[8,256], index: 4, kind: output, shape index: {1}, may-alias: {2,4}]  }
   0x1   :  { %56 = vset.pattern.permute.xlu0 %v58_v0  ;;  %v16_v1 = vld [vmem:[%s112_s0] sm:$0xff]  ;;  %v18_v4 = vld [vmem:[%s113_s1 + $0x8] sm:$0xff] }
   0x2   :  { %25 = vperm.xlu0 %56, %v16_v1   ;;  %v17_v3 = vld [vmem:[%s113_s1] sm:$0xff]  ;;  %vm22_vm1 = vcmp.gt.f32.partialorder %v18_v4, 0.0  ;;  %v20_v11 = vld [vmem:[%s115_s2 + $0x8] sm:$0xff] }
   0x3   :  { %vm21_vm0 = vcmp.gt.f32.partialorder %v17_v3, 0.0  ;;  %v19_v10 = vld [vmem:[%s115_s2] sm:$0xff]  ;;  %vm35_vm3 = vcmp.gt.f32.partialorder %v20_v11, 0.0 }
   0x4   :  { %vm34_vm2 = vcmp.gt.f32.partialorder %v19_v10, 0.0 }
   0xa   :  { %57 = vset.pattern.permute.xlu0 %v59_v2 }
   0xb   :  { %37 = vperm.xlu0 %57, %v16_v1  }
  0x74   :  { %v26_v5 = vpop.permute.xlu0 %25 }
  0x75   :  { %v28_v6 = vmul.f32 %v26_v5, %v17_v3  ;;  %v29_v7 = vmul.f32 %v26_v5, %v18_v4 }
  0x77   :  { %v30_v8 = vsel %vm21_vm0, %v17_v3, %v28_v6  ;;  %v31_v9 = vsel %vm22_vm1, %v18_v4, %v29_v7 }
  0x78   :  { %32 = vst [vmem:[%s114_s3] sm:$0xff] %v30_v8 }
  0x79   :  { %33 = vst [vmem:[%s114_s3 + $0x8] sm:$0xff] %v31_v9 }
  0x7d   :  { %v38_v12 = vpop.permute.xlu0 %37 }
  0x7e   :  { %v40_v13 = vmul.f32 %v38_v12, %v19_v10  ;;  %v41_v14 = vmul.f32 %v38_v12, %v20_v11 }
  0x80   :  { %v42_v15 = vsel %vm34_vm2, %v19_v10, %v40_v13  ;;  %v43_v16 = vsel %vm35_vm3, %v20_v11, %v41_v14 }
  0x81   :  { %44 = vst [vmem:[%s116_s4] sm:$0xff] %v42_v15 }
  0x82   :  { %45 = vst [vmem:[%s116_s4 + $0x8] sm:$0xff] %v43_v16 }

</bundles_post_ra>
